<compile_context>
chip_gen: v5e
topology: v5e:2x2
jax: 0.10.0
libtpu: 0.0.40
codegen_flags: <defaults>
</compile_context>

<pallas_src>
import numpy as np
import jax
import jax.numpy as jnp
from jax.experimental import pallas as pl
from jax.experimental.pallas import tpu as pltpu


# ----------------------------------------------------------------------------
# Host-side (glue): exact operators for adaptive avg-pool and bilinear upsample
# ----------------------------------------------------------------------------
def _adaptive_avg_pool_matrix(L, s):
    """A[i, k] such that (A @ v) reproduces nn.AdaptiveAvgPool1d(s) bins."""
    A = np.zeros((s, L), dtype=np.float32)
    for i in range(s):
        start = (i * L) // s                 # floor(i*L/s)
        end = -((-(i + 1) * L) // s)         # ceil((i+1)*L/s)
        A[i, start:end] = 1.0 / float(end - start)
    return A


def _bilinear_upsample_matrix(L, s):
    """U[h, i]: F.interpolate(mode='bilinear', align_corners=True) from s -> L."""
    U = np.zeros((L, s), dtype=np.float32)
    if s == 1 or L == 1:                     # guard L==1 (avoid div-by-zero)
        U[:, 0] = 1.0
        return U
    for h in range(L):
        coord = h * (s - 1) / (L - 1)
        i0 = min(int(np.floor(coord)), s - 1)
        i1 = min(i0 + 1, s - 1)
        w1 = coord - i0
        U[h, i0] += 1.0 - w1
        U[h, i1] += w1
    return U


def build_psp_operators(H, W, sizes):
    """Per-branch transposed pooling / upsampling operators (lane-dense layout).

    at_list[b]: (H*W, s*s)  so  pooled^T = x(C,HW) @ At  -> (C, s*s)
    ut_list[b]: (s*s, H*W)  so  out^T    = y(Cout,s*s) @ Ut -> (Cout, HW)
    """
    at_list, ut_list = [], []
    for s in sizes:
        Ah = _adaptive_avg_pool_matrix(H, s)
        Aw = _adaptive_avg_pool_matrix(W, s)
        Uh = _bilinear_upsample_matrix(H, s)
        Uw = _bilinear_upsample_matrix(W, s)
        A = np.kron(Ah, Aw)                  # (s*s, H*W)
        U = np.kron(Uh, Uw)                  # (H*W, s*s)
        at_list.append(jnp.asarray(A.T))     # (H*W, s*s)
        ut_list.append(jnp.asarray(U.T))     # (s*s, H*W)
    return at_list, ut_list


# ----------------------------------------------------------------------------
# Pallas kernel: all pyramid branches fused, one batch element per grid step
# ----------------------------------------------------------------------------
def _make_psp_fused_kernel(C, Cout, n_branch, branch_ss):
    def kernel(*refs):
        # refs = (x, At_0..At_{B-1}, Ut_0..Ut_{B-1}, w_all, bias_all, out)
        x_ref = refs[0]                                  # (C, HW)
        at_refs = refs[1:1 + n_branch]                   # (HW, ss_b)
        ut_refs = refs[1 + n_branch:1 + 2 * n_branch]    # (ss_b, HW)
        w_ref = refs[1 + 2 * n_branch]                   # (n_branch*Cout, C)
        b_ref = refs[2 + 2 * n_branch]                   # (n_branch*Cout, 1)
        o_ref = refs[3 + 2 * n_branch]                   # (C + n_branch*Cout, HW)

        HW = x_ref.shape[-1]
        x_in = x_ref[...]
        # feats[0] = x : passthrough copy into the first C output channels.
        o_ref[pl.ds(0, C), :] = x_in.astype(o_ref.dtype)

        x = x_in.astype(jnp.float32)
        for b in range(n_branch):
            ss = branch_ss[b]
            w = w_ref[pl.ds(b * Cout, Cout), :]          # (Cout, C) BN-folded
            bias = b_ref[pl.ds(b * Cout, Cout), :]       # (Cout, 1)
            if ss == 1:
                # Adaptive pool to 1x1 == global mean; bilinear upsample from
                # a single pixel (align_corners=True) == broadcast.
                pooled = jnp.mean(x, axis=1, keepdims=True)              # (C, 1)
                y = jnp.dot(w, pooled, preferred_element_type=jnp.float32) + bias
                y = jnp.maximum(y, 0.0)                                  # (Cout, 1)
                out = jnp.broadcast_to(y, (Cout, HW))
            else:
                pooled = jnp.dot(x, at_refs[b][...],
                                 preferred_element_type=jnp.float32)     # (C, ss)
                y = jnp.dot(w, pooled,
                            preferred_element_type=jnp.float32) + bias   # (Cout, ss)
                y = jnp.maximum(y, 0.0)
                out = jnp.dot(y, ut_refs[b][...],
                              preferred_element_type=jnp.float32)        # (Cout, HW)
            o_ref[pl.ds(C + b * Cout, Cout), :] = out.astype(o_ref.dtype)

    return kernel


def _run_psp_fused(x_flat, at_list, ut_list, w_all, bias_all, Cout):
    N, C, HW = x_flat.shape
    n_branch = len(at_list)
    branch_ss = tuple(int(a.shape[1]) for a in at_list)
    C_total = C + n_branch * Cout

    in_specs = [pl.BlockSpec((None, C, HW), lambda n: (n, 0, 0))]
    for ss in branch_ss:
        in_specs.append(pl.BlockSpec((HW, ss), lambda n: (0, 0)))
    for ss in branch_ss:
        in_specs.append(pl.BlockSpec((ss, HW), lambda n: (0, 0)))
    in_specs.append(pl.BlockSpec((n_branch * Cout, C), lambda n: (0, 0)))
    in_specs.append(pl.BlockSpec((n_branch * Cout, 1), lambda n: (0, 0)))
    out_spec = pl.BlockSpec((None, C_total, HW), lambda n: (n, 0, 0))

    kernel = _make_psp_fused_kernel(C, Cout, n_branch, branch_ss)
    return pl.pallas_call(
        kernel,
        out_shape=jax.ShapeDtypeStruct((N, C_total, HW), x_flat.dtype),
        grid_spec=pltpu.PrefetchScalarGridSpec(
            num_scalar_prefetch=0,
            grid=(N,),
            in_specs=in_specs,
            out_specs=out_spec,
        ),
        compiler_params=pltpu.CompilerParams(
            dimension_semantics=("parallel",),
            vmem_limit_bytes=32 * 1024 * 1024,
        ),
    )(x_flat, *at_list, *ut_list, w_all, bias_all)


# ----------------------------------------------------------------------------
# Parameter init (deterministic, synthetic) and module forward
# ----------------------------------------------------------------------------
def init_psp_params(key, in_channels, sizes=(1, 2, 3, 6), eps=1e-5):
    cout = in_channels // 4
    w_rows, b_rows = [], []
    for _ in sizes:
        key, kw, kg, kb, km, kv = jax.random.split(key, 6)
        # nn.Conv2d(in_channels, cout, 1, bias=False) weight: (cout, C)
        w = jax.random.normal(kw, (cout, in_channels), jnp.float32) / np.sqrt(in_channels)
        gamma = 1.0 + 0.1 * jax.random.normal(kg, (cout,), jnp.float32)
        beta = 0.1 * jax.random.normal(kb, (cout,), jnp.float32)
        running_mean = 0.1 * jax.random.normal(km, (cout,), jnp.float32)
        running_var = 1.0 + 0.1 * jnp.abs(jax.random.normal(kv, (cout,), jnp.float32))
        scale = gamma / jnp.sqrt(running_var + eps)
        bias = beta - running_mean * scale
        w_rows.append(w * scale[:, None])          # fold BN scale into conv weight
        b_rows.append(bias.reshape(cout, 1))
    return dict(
        sizes=tuple(int(s) for s in sizes),
        cout=cout,
        w_all=jnp.concatenate(w_rows, axis=0),     # (n_branch*cout, C)
        bias_all=jnp.concatenate(b_rows, axis=0),  # (n_branch*cout, 1)
    )


def psp_module_forward(x_nchw, params):
    """Equivalent of _PSPModule.forward: concat([x] + upsampled branches, dim=1)."""
    N, C, H, W = x_nchw.shape
    cout = params["cout"]
    sizes = params["sizes"]
    at_list, ut_list = build_psp_operators(H, W, sizes)
    x_flat = x_nchw.reshape(N, C, H * W)           # NCHW is already (C, HW)-major
    out = _run_psp_fused(x_flat, at_list, ut_list,
                         params["w_all"], params["bias_all"], cout)
    return out.reshape(N, C + len(sizes) * cout, H, W)


# ----------------------------------------------------------------------------
# Pure-JAX reference (for in-script correctness check)
# ----------------------------------------------------------------------------
def _psp_reference(x_nchw, params):
    N, C, H, W = x_nchw.shape
    cout = params["cout"]
    sizes = params["sizes"]
    at_list, ut_list = build_psp_operators(H, W, sizes)
    xf = x_nchw.reshape(N, C, H * W).astype(jnp.float32)
    feats = [x_nchw]
    for b in range(len(sizes)):
        pooled = jnp.einsum("nch,hs->ncs", xf, at_list[b], precision="highest")
        w = params["w_all"][b * cout:(b + 1) * cout]
        bias = params["bias_all"][b * cout:(b + 1) * cout]
        y = jnp.maximum(
            jnp.einsum("oc,ncs->nos", w, pooled, precision="highest") + bias[None],
            0.0)
        o = jnp.einsum("nos,sh->noh", y, ut_list[b], precision="highest")
        feats.append(o.reshape(N, cout, H, W).astype(x_nchw.dtype))
    return jnp.concatenate(feats, axis=1)


if __name__ == "__main__":
    key = jax.random.PRNGKey(0)
    kx, kp = jax.random.split(key)

    N, C, H, W = 2, 32, 16, 16                 # in_channels=32 -> 8 ch per branch
    x = jax.random.normal(kx, (N, C, H, W), jnp.float32)
    params = init_psp_params(kp, C, sizes=(1, 2, 3, 6))

    out = jax.block_until_ready(psp_module_forward(x, params))

    expected_channels = C + 4 * (C // 4)       # 64
    assert out.shape == (N, expected_channels, H, W), out.shape
    assert bool(jnp.all(jnp.isfinite(out)))

    ref = jax.block_until_ready(_psp_reference(x, params))
    assert bool(jnp.allclose(out, ref, atol=2e-3, rtol=2e-3)), \
        float(jnp.max(jnp.abs(out - ref)))

    print("KERNEL_OK")
</pallas_src>

<mosaic_0001>
module attributes {stable_mosaic.version = 11 : i64} {
  func.func @kernel(%arg0: i32, %arg1: memref<1x32x256xf32, #tpu.memory_space<vmem>>, %arg2: memref<256x1xf32, #tpu.memory_space<vmem>>, %arg3: memref<256x4xf32, #tpu.memory_space<vmem>>, %arg4: memref<256x9xf32, #tpu.memory_space<vmem>>, %arg5: memref<256x36xf32, #tpu.memory_space<vmem>>, %arg6: memref<1x256xf32, #tpu.memory_space<vmem>>, %arg7: memref<4x256xf32, #tpu.memory_space<vmem>>, %arg8: memref<9x256xf32, #tpu.memory_space<vmem>>, %arg9: memref<36x256xf32, #tpu.memory_space<vmem>>, %arg10: memref<32x32xf32, #tpu.memory_space<vmem>>, %arg11: memref<32x1xf32, #tpu.memory_space<vmem>>, %arg12: memref<1x64x256xf32, #tpu.memory_space<vmem>>) attributes {dimension_semantics = [#tpu.dimension_semantics<parallel>], iteration_bounds = array<i64: 2>, scalar_prefetch = 0 : i64, scratch_operands = 0 : i64, tpu.core_type = #tpu.core_type<tc>, window_params = [{transform_indices = @transform_0, window_bounds = array<i64: 1, 32, 256>}, {pipeline_mode = #tpu.pipeline_mode<synchronous>, transform_indices = @transform_1, window_bounds = array<i64: 256, 1>}, {pipeline_mode = #tpu.pipeline_mode<synchronous>, transform_indices = @transform_2, window_bounds = array<i64: 256, 4>}, {pipeline_mode = #tpu.pipeline_mode<synchronous>, transform_indices = @transform_3, window_bounds = array<i64: 256, 9>}, {pipeline_mode = #tpu.pipeline_mode<synchronous>, transform_indices = @transform_4, window_bounds = array<i64: 256, 36>}, {pipeline_mode = #tpu.pipeline_mode<synchronous>, transform_indices = @transform_5, window_bounds = array<i64: 1, 256>}, {pipeline_mode = #tpu.pipeline_mode<synchronous>, transform_indices = @transform_6, window_bounds = array<i64: 4, 256>}, {pipeline_mode = #tpu.pipeline_mode<synchronous>, transform_indices = @transform_7, window_bounds = array<i64: 9, 256>}, {pipeline_mode = #tpu.pipeline_mode<synchronous>, transform_indices = @transform_8, window_bounds = array<i64: 36, 256>}, {pipeline_mode = #tpu.pipeline_mode<synchronous>, transform_indices = @transform_9, window_bounds = array<i64: 32, 32>}, {pipeline_mode = #tpu.pipeline_mode<synchronous>, transform_indices = @transform_10, window_bounds = array<i64: 32, 1>}, {transform_indices = @transform_11, window_bounds = array<i64: 1, 64, 256>}]} {
    %c0 = arith.constant 0 : index
    %c0_0 = arith.constant 0 : index
    %c0_1 = arith.constant 0 : index
    %0 = vector.load %arg1[%c0, %c0_0, %c0_1] : memref<1x32x256xf32, #tpu.memory_space<vmem>>, vector<1x32x256xf32>
    %1 = vector.shape_cast %0 : vector<1x32x256xf32> to vector<32x256xf32>
    %c0_2 = arith.constant 0 : index
    %c0_3 = arith.constant 0 : index
    %c0_4 = arith.constant 0 : index
    %2 = vector.load %arg12[%c0_2, %c0_3, %c0_4] : memref<1x64x256xf32, #tpu.memory_space<vmem>>, vector<1x32x256xf32>
    %3 = vector.shape_cast %2 : vector<1x32x256xf32> to vector<32x256xf32>
    %4 = vector.shape_cast %1 : vector<32x256xf32> to vector<1x32x256xf32>
    tpu.vector_store %arg12[%c0_2, %c0_3, %c0_4], %4 {strides = array<i32>} : memref<1x64x256xf32, #tpu.memory_space<vmem>>, vector<1x32x256xf32>,
    %c0_5 = arith.constant 0 : index
    %c0_6 = arith.constant 0 : index
    %5 = vector.load %arg10[%c0_5, %c0_6] : memref<32x32xf32, #tpu.memory_space<vmem>>, vector<8x32xf32>
    %c0_7 = arith.constant 0 : index
    %c0_8 = arith.constant 0 : index
    %6 = vector.load %arg11[%c0_7, %c0_8] : memref<32x1xf32, #tpu.memory_space<vmem>>, vector<8x1xf32>
    %cst = arith.constant dense<0.000000e+00> : vector<32xf32>
    %7 = vector.multi_reduction <add>, %1, %cst [1] : vector<32x256xf32> to vector<32xf32>
    %8 = vector.shape_cast %7 : vector<32xf32> to vector<32x1xf32>
    %cst_9 = arith.constant 2.560000e+02 : f32
    %9 = vector.broadcast %cst_9 : f32 to vector<32x1xf32>
    %10 = arith.divf %8, %9 : vector<32x1xf32>
    %cst_10 = arith.constant dense<0.000000e+00> : vector<8x1xf32>
    %11 = tpu.matmul %5, %10, %cst_10 {dimension_numbers = #tpu.dot_dimension_numbers<[1], [0], [0], [1], [0, 0, 1, 1], [], []>} : vector<8x32xf32>, vector<32x1xf32>, vector<8x1xf32> -> vector<8x1xf32>
    %12 = arith.addf %11, %6 : vector<8x1xf32>
    %cst_11 = arith.constant 0.000000e+00 : f32
    %13 = vector.broadcast %cst_11 : f32 to vector<8x1xf32>
    %14 = arith.maximumf %12, %13 : vector<8x1xf32>
    %15 = vector.shape_cast %14 : vector<8x1xf32> to vector<8x1xf32>
    %16 = vector.broadcast %15 : vector<8x1xf32> to vector<8x256xf32>
    %c0_12 = arith.constant 0 : index
    %c32 = arith.constant 32 : index
    %c0_13 = arith.constant 0 : index
    %17 = vector.load %arg12[%c0_12, %c32, %c0_13] : memref<1x64x256xf32, #tpu.memory_space<vmem>>, vector<1x8x256xf32>
    %18 = vector.shape_cast %17 : vector<1x8x256xf32> to vector<8x256xf32>
    %19 = vector.shape_cast %16 : vector<8x256xf32> to vector<1x8x256xf32>
    tpu.vector_store %arg12[%c0_12, %c32, %c0_13], %19 {strides = array<i32>} : memref<1x64x256xf32, #tpu.memory_space<vmem>>, vector<1x8x256xf32>,
    %c8 = arith.constant 8 : index
    %c0_14 = arith.constant 0 : index
    %20 = vector.load %arg10[%c8, %c0_14] : memref<32x32xf32, #tpu.memory_space<vmem>>, vector<8x32xf32>
    %c8_15 = arith.constant 8 : index
    %c0_16 = arith.constant 0 : index
    %21 = vector.load %arg11[%c8_15, %c0_16] : memref<32x1xf32, #tpu.memory_space<vmem>>, vector<8x1xf32>
    %c0_17 = arith.constant 0 : index
    %c0_18 = arith.constant 0 : index
    %22 = vector.load %arg3[%c0_17, %c0_18] : memref<256x4xf32, #tpu.memory_space<vmem>>, vector<256x4xf32>
    %cst_19 = arith.constant dense<0.000000e+00> : vector<32x4xf32>
    %23 = tpu.matmul %1, %22, %cst_19 {dimension_numbers = #tpu.dot_dimension_numbers<[1], [0], [0], [1], [0, 0, 1, 1], [], []>} : vector<32x256xf32>, vector<256x4xf32>, vector<32x4xf32> -> vector<32x4xf32>
    %cst_20 = arith.constant dense<0.000000e+00> : vector<8x4xf32>
    %24 = tpu.matmul %20, %23, %cst_20 {dimension_numbers = #tpu.dot_dimension_numbers<[1], [0], [0], [1], [0, 0, 1, 1], [], []>} : vector<8x32xf32>, vector<32x4xf32>, vector<8x4xf32> -> vector<8x4xf32>
    %25 = vector.broadcast %21 : vector<8x1xf32> to vector<8x4xf32>
    %26 = arith.addf %24, %25 : vector<8x4xf32>
    %cst_21 = arith.constant 0.000000e+00 : f32
    %27 = vector.broadcast %cst_21 : f32 to vector<8x4xf32>
    %28 = arith.maximumf %26, %27 : vector<8x4xf32>
    %c0_22 = arith.constant 0 : index
    %c0_23 = arith.constant 0 : index
    %29 = vector.load %arg7[%c0_22, %c0_23] : memref<4x256xf32, #tpu.memory_space<vmem>>, vector<4x256xf32>
    %cst_24 = arith.constant dense<0.000000e+00> : vector<8x256xf32>
    %30 = tpu.matmul %28, %29, %cst_24 {dimension_numbers = #tpu.dot_dimension_numbers<[1], [0], [0], [1], [0, 0, 1, 1], [], []>} : vector<8x4xf32>, vector<4x256xf32>, vector<8x256xf32> -> vector<8x256xf32>
    %c0_25 = arith.constant 0 : index
    %c40 = arith.constant 40 : index
    %c0_26 = arith.constant 0 : index
    %31 = vector.load %arg12[%c0_25, %c40, %c0_26] : memref<1x64x256xf32, #tpu.memory_space<vmem>>, vector<1x8x256xf32>
    %32 = vector.shape_cast %31 : vector<1x8x256xf32> to vector<8x256xf32>
    %33 = vector.shape_cast %30 : vector<8x256xf32> to vector<1x8x256xf32>
    tpu.vector_store %arg12[%c0_25, %c40, %c0_26], %33 {strides = array<i32>} : memref<1x64x256xf32, #tpu.memory_space<vmem>>, vector<1x8x256xf32>,
    %c16 = arith.constant 16 : index
    %c0_27 = arith.constant 0 : index
    %34 = vector.load %arg10[%c16, %c0_27] : memref<32x32xf32, #tpu.memory_space<vmem>>, vector<8x32xf32>
    %c16_28 = arith.constant 16 : index
    %c0_29 = arith.constant 0 : index
    %35 = vector.load %arg11[%c16_28, %c0_29] : memref<32x1xf32, #tpu.memory_space<vmem>>, vector<8x1xf32>
    %c0_30 = arith.constant 0 : index
    %c0_31 = arith.constant 0 : index
    %36 = vector.load %arg4[%c0_30, %c0_31] : memref<256x9xf32, #tpu.memory_space<vmem>>, vector<256x9xf32>
    %cst_32 = arith.constant dense<0.000000e+00> : vector<32x9xf32>
    %37 = tpu.matmul %1, %36, %cst_32 {dimension_numbers = #tpu.dot_dimension_numbers<[1], [0], [0], [1], [0, 0, 1, 1], [], []>} : vector<32x256xf32>, vector<256x9xf32>, vector<32x9xf32> -> vector<32x9xf32>
    %cst_33 = arith.constant dense<0.000000e+00> : vector<8x9xf32>
    %38 = tpu.matmul %34, %37, %cst_33 {dimension_numbers = #tpu.dot_dimension_numbers<[1], [0], [0], [1], [0, 0, 1, 1], [], []>} : vector<8x32xf32>, vector<32x9xf32>, vector<8x9xf32> -> vector<8x9xf32>
    %39 = vector.broadcast %35 : vector<8x1xf32> to vector<8x9xf32>
    %40 = arith.addf %38, %39 : vector<8x9xf32>
    %cst_34 = arith.constant 0.000000e+00 : f32
    %41 = vector.broadcast %cst_34 : f32 to vector<8x9xf32>
    %42 = arith.maximumf %40, %41 : vector<8x9xf32>
    %c0_35 = arith.constant 0 : index
    %c0_36 = arith.constant 0 : index
    %43 = vector.load %arg8[%c0_35, %c0_36] : memref<9x256xf32, #tpu.memory_space<vmem>>, vector<9x256xf32>
    %cst_37 = arith.constant dense<0.000000e+00> : vector<8x256xf32>
    %44 = tpu.matmul %42, %43, %cst_37 {dimension_numbers = #tpu.dot_dimension_numbers<[1], [0], [0], [1], [0, 0, 1, 1], [], []>} : vector<8x9xf32>, vector<9x256xf32>, vector<8x256xf32> -> vector<8x256xf32>
    %c0_38 = arith.constant 0 : index
    %c48 = arith.constant 48 : index
    %c0_39 = arith.constant 0 : index
    %45 = vector.load %arg12[%c0_38, %c48, %c0_39] : memref<1x64x256xf32, #tpu.memory_space<vmem>>, vector<1x8x256xf32>
    %46 = vector.shape_cast %45 : vector<1x8x256xf32> to vector<8x256xf32>
    %47 = vector.shape_cast %44 : vector<8x256xf32> to vector<1x8x256xf32>
    tpu.vector_store %arg12[%c0_38, %c48, %c0_39], %47 {strides = array<i32>} : memref<1x64x256xf32, #tpu.memory_space<vmem>>, vector<1x8x256xf32>,
    %c24 = arith.constant 24 : index
    %c0_40 = arith.constant 0 : index
    %48 = vector.load %arg10[%c24, %c0_40] : memref<32x32xf32, #tpu.memory_space<vmem>>, vector<8x32xf32>
    %c24_41 = arith.constant 24 : index
    %c0_42 = arith.constant 0 : index
    %49 = vector.load %arg11[%c24_41, %c0_42] : memref<32x1xf32, #tpu.memory_space<vmem>>, vector<8x1xf32>
    %c0_43 = arith.constant 0 : index
    %c0_44 = arith.constant 0 : index
    %50 = vector.load %arg5[%c0_43, %c0_44] : memref<256x36xf32, #tpu.memory_space<vmem>>, vector<256x36xf32>
    %cst_45 = arith.constant dense<0.000000e+00> : vector<32x36xf32>
    %51 = tpu.matmul %1, %50, %cst_45 {dimension_numbers = #tpu.dot_dimension_numbers<[1], [0], [0], [1], [0, 0, 1, 1], [], []>} : vector<32x256xf32>, vector<256x36xf32>, vector<32x36xf32> -> vector<32x36xf32>
    %cst_46 = arith.constant dense<0.000000e+00> : vector<8x36xf32>
    %52 = tpu.matmul %48, %51, %cst_46 {dimension_numbers = #tpu.dot_dimension_numbers<[1], [0], [0], [1], [0, 0, 1, 1], [], []>} : vector<8x32xf32>, vector<32x36xf32>, vector<8x36xf32> -> vector<8x36xf32>
    %53 = vector.broadcast %49 : vector<8x1xf32> to vector<8x36xf32>
    %54 = arith.addf %52, %53 : vector<8x36xf32>
    %cst_47 = arith.constant 0.000000e+00 : f32
    %55 = vector.broadcast %cst_47 : f32 to vector<8x36xf32>
    %56 = arith.maximumf %54, %55 : vector<8x36xf32>
    %c0_48 = arith.constant 0 : index
    %c0_49 = arith.constant 0 : index
    %57 = vector.load %arg9[%c0_48, %c0_49] : memref<36x256xf32, #tpu.memory_space<vmem>>, vector<36x256xf32>
    %cst_50 = arith.constant dense<0.000000e+00> : vector<8x256xf32>
    %58 = tpu.matmul %56, %57, %cst_50 {dimension_numbers = #tpu.dot_dimension_numbers<[1], [0], [0], [1], [0, 0, 1, 1], [], []>} : vector<8x36xf32>, vector<36x256xf32>, vector<8x256xf32> -> vector<8x256xf32>
    %c0_51 = arith.constant 0 : index
    %c56 = arith.constant 56 : index
    %c0_52 = arith.constant 0 : index
    %59 = vector.load %arg12[%c0_51, %c56, %c0_52] : memref<1x64x256xf32, #tpu.memory_space<vmem>>, vector<1x8x256xf32>
    %60 = vector.shape_cast %59 : vector<1x8x256xf32> to vector<8x256xf32>
    %61 = vector.shape_cast %58 : vector<8x256xf32> to vector<1x8x256xf32>
    tpu.vector_store %arg12[%c0_51, %c56, %c0_52], %61 {strides = array<i32>} : memref<1x64x256xf32, #tpu.memory_space<vmem>>, vector<1x8x256xf32>,
    return
  }
  func.func @transform_0(%arg0: i32) -> (i32, i32, i32) {
    %c0_i32 = arith.constant 0 : i32
    %c0_i32_0 = arith.constant 0 : i32
    %c0_i32_1 = arith.constant 0 : i32
    return %arg0, %c0_i32, %c0_i32_0 : i32, i32, i32
  }
  func.func @transform_1(%arg0: i32) -> (i32, i32) {
    %c0_i32 = arith.constant 0 : i32
    %c0_i32_0 = arith.constant 0 : i32
    %c0_i32_1 = arith.constant 0 : i32
    return %c0_i32, %c0_i32_0 : i32, i32
  }
  func.func @transform_2(%arg0: i32) -> (i32, i32) {
    %c0_i32 = arith.constant 0 : i32
    %c0_i32_0 = arith.constant 0 : i32
    %c0_i32_1 = arith.constant 0 : i32
    return %c0_i32, %c0_i32_0 : i32, i32
  }
  func.func @transform_3(%arg0: i32) -> (i32, i32) {
    %c0_i32 = arith.constant 0 : i32
    %c0_i32_0 = arith.constant 0 : i32
    %c0_i32_1 = arith.constant 0 : i32
    return %c0_i32, %c0_i32_0 : i32, i32
  }
  func.func @transform_4(%arg0: i32) -> (i32, i32) {
    %c0_i32 = arith.constant 0 : i32
    %c0_i32_0 = arith.constant 0 : i32
    %c0_i32_1 = arith.constant 0 : i32
    return %c0_i32, %c0_i32_0 : i32, i32
  }
  func.func @transform_5(%arg0: i32) -> (i32, i32) {
    %c0_i32 = arith.constant 0 : i32
    %c0_i32_0 = arith.constant 0 : i32
    %c0_i32_1 = arith.constant 0 : i32
    return %c0_i32, %c0_i32_0 : i32, i32
  }
  func.func @transform_6(%arg0: i32) -> (i32, i32) {
    %c0_i32 = arith.constant 0 : i32
    %c0_i32_0 = arith.constant 0 : i32
    %c0_i32_1 = arith.constant 0 : i32
    return %c0_i32, %c0_i32_0 : i32, i32
  }
  func.func @transform_7(%arg0: i32) -> (i32, i32) {
    %c0_i32 = arith.constant 0 : i32
    %c0_i32_0 = arith.constant 0 : i32
    %c0_i32_1 = arith.constant 0 : i32
    return %c0_i32, %c0_i32_0 : i32, i32
  }
  func.func @transform_8(%arg0: i32) -> (i32, i32) {
    %c0_i32 = arith.constant 0 : i32
    %c0_i32_0 = arith.constant 0 : i32
    %c0_i32_1 = arith.constant 0 : i32
    return %c0_i32, %c0_i32_0 : i32, i32
  }
  func.func @transform_9(%arg0: i32) -> (i32, i32) {
    %c0_i32 = arith.constant 0 : i32
    %c0_i32_0 = arith.constant 0 : i32
    %c0_i32_1 = arith.constant 0 : i32
    return %c0_i32, %c0_i32_0 : i32, i32
  }
  func.func @transform_10(%arg0: i32) -> (i32, i32) {
    %c0_i32 = arith.constant 0 : i32
    %c0_i32_0 = arith.constant 0 : i32
    %c0_i32_1 = arith.constant 0 : i32
    return %c0_i32, %c0_i32_0 : i32, i32
  }
  func.func @transform_11(%arg0: i32) -> (i32, i32, i32) {
    %c0_i32 = arith.constant 0 : i32
    %c0_i32_0 = arith.constant 0 : i32
    %c0_i32_1 = arith.constant 0 : i32
    return %arg0, %c0_i32, %c0_i32_0 : i32, i32, i32
  }
}

</mosaic_0001>

<bundles_post_ra>
// kernel: tpu_custom_call.1
= control target key start
LH: loop header
LB: loop body
LE: loop exit
PB: predicated region body
PF: predicated region fallthrough
CT: control target
= control target key end

     0   :  { %16 = vsyncpa [#allocation3], 0  ;;  %s1811_s0 = inlined_call_operand.vmem [shape: f32[2,32,256], index: 0, kind: input, shape index: {}]   ;;  %s1812_s1 = inlined_call_operand.vmem [shape: f32[256,1], index: 1, kind: input, shape index: {}]   ;;  %s1813_s2 = inlined_call_operand.vmem [shape: f32[256,4], index: 2, kind: input, shape index: {}]   ;;  %s1814_s3 = inlined_call_operand.vmem [shape: f32[256,9], index: 3, kind: input, shape index: {}]   ;;  %s1815_s4 = inlined_call_operand.vmem [shape: f32[256,36], index: 4, kind: input, shape index: {}]   ;;  %s1816_s5 = inlined_call_operand.vmem [shape: f32[1,256], index: 5, kind: input, shape index: {}]   ;;  %s1817_s6 = inlined_call_operand.vmem [shape: f32[4,256], index: 6, kind: input, shape index: {}]   ;;  %s1818_s7 = inlined_call_operand.vmem [shape: f32[9,256], index: 7, kind: input, shape index: {}]   ;;  %s1819_s8 = inlined_call_operand.vmem [shape: f32[36,256], index: 8, kind: input, shape index: {}]   ;;  %s1820_s9 = inlined_call_operand.vmem [shape: f32[32,32], index: 9, kind: input, shape index: {}]   ;;  %s1821_s10 = inlined_call_operand.vmem [shape: f32[32,1], index: 10, kind: input, shape index: {}]   ;;  %s1822_s11 = inlined_call_operand.hbm [shape: f32[2,64,256], index: 11, kind: output, shape index: {}]  }
   0x1   :  { %18 = vsyncpa [#allocation3 + $0x1], 0  ;;  %s1280_s5 = smov 0   ;;  %s1282_s16 = smov 0  }
   0x2   :  { %s1284_s17 = smov 0   ;;  %s1286_s18 = smov 0  }
   0x3 LB: > { %s1301_s19 = sadd.s32 4294967295, %s1214_s18   ;;  %s1074_s20 = sadd.s32 4294967294, %s1214_s18   ;;  %s1214_s18 = sphi %s1286_s18, %s1828_s18   ;;  %s1210_s17 = sphi %s1284_s17, %s1827_s17   ;;  %s1206_s16 = sphi %s1282_s16, %s1826_s16   ;;  %s1202_s5 = sphi %s1280_s5, %s1825_s5  }
   0x4   : > { %s1305_s21 = sadd.s32 1, %s1214_s18   ;;  %s267_s22 = sadd.s32 1, %s1210_s17 }
   0x5   : > { %s264_s23 = ssub.s32 %s1214_s18, %s1305_s21  ;;  %p277_p0 = scmp.ne.s32.totalorder %s1210_s17, %s1206_s16 }
   0x6   : > { %p265_p1 = scmp.eq.s32.totalorder %s264_s23, 0  ;;  %p278_p2 = scmp.eq.s32.totalorder %s1301_s19, 1 }
   0x7   : > { %p283_p3 = scmp.ne.s32.totalorder %s1206_s16, %s1202_s5  ;;  %p284_p4 = scmp.eq.s32.totalorder %s1074_s20, 1 }
   0x8   : > { %s1316_s24 = scalar_select %p265_p1, %s1210_s17, %s267_s22  }
   0x9   : > { %p1318_p5 = por %p278_p2, %p277_p0  ;;  %p1322_p6 = por %p284_p4, %p283_p3 }
   0xa   : > { %p1077_p7 = scmp.ge.s32.totalorder %s1214_s18, 1  ;;  %p340_p8 = scmp.lt.s32.totalorder %s1214_s18, 3 }
   0xc   : > { %p341_p9 = pnand %p1077_p7, %p340_p8 }
   0xd   : > { %p380_p10 = scmp.lt.s32.totalorder (!%p341_p9), %s1301_s19, 1  ;;  %s377_s27 = sand.u32 (!%p341_p9), 1, %s1206_s16  }
   0xe   : > { %344 = sbr.rel (%p341_p9) target bundleno = 1067 (0x42b), region = 64  ;;  %s1078_s1 = sshll.u32 (!%p341_p9), %s377_s27, 7 }
   0xf   : > { %s1344_s14 = scalar_lea.vmem (!%p341_p9), [#allocation2], %s1078_s1  ;;  %s1103_s12 = sshll.u32 (!%p341_p9), %s1301_s19, 7 }
  0x10   : > { %s1008_s20 = scalar_lea.hbm (!%p341_p9), %s1822_s11, %s1103_s12  ;;  %s1009_s22 = sshll.u32 (!%p341_p9), %s1344_s14, 4  ;;  %s1010_s22 = int_to_ptr.vmem [resolvable:$true] %s1009_s22 }
  0x11   : > { %s1011_s23 = sshll.u32 (!%p341_p9), %s1008_s20, 4  ;;  %s1172_s12 = scalar_lea.hbm (!%p341_p9), %s1822_s11, 256  ;;  %s1012_s23 = int_to_ptr.hbm [resolvable:$true] %s1011_s23 }
  0x12   : > { %s1166_s1 = sshra.s32 (!%p341_p9), %s1012_s23, 4  ;;  %s1167_s1 = int_to_ptr.hbm [resolvable:$true] %s1166_s1 }
  0x13   : > { %s381_s28 = scalar_select %p380_p10, %s1301_s19, 1  ;;  %v1216_v12 = vmov 256.0   ;;  %v491_v13 = vld [vmem:[%s1813_s2 + $0xf8] sm:$0xff]  ;;  %v490_v15 = vld [vmem:[%s1813_s2 + $0xf0] sm:$0xff]  ;;  %v489_v16 = vld [vmem:[%s1813_s2 + $0xe8] sm:$0xff]  ;;  %vm426_vm1 = vcmask 261120  }
  0x14   : > { %1150 = vrcp.f32 %v1216_v12  ;;  %521 = vmatpush.msra.mxu2 %v491_v13  ;;  %v488_v18 = vld [vmem:[%s1813_s2 + $0xe0] sm:$0xff]  ;;  %v487_v19 = vld [vmem:[%s1813_s2 + $0xd8] sm:$0xff]  ;;  %v486_v21 = vld [vmem:[%s1813_s2 + $0xd0] sm:$0xff]  ;;  %v1217_v60 = vmov 0   ;;  %vm588_vm2 = vcmask 1043456   ;;  %vm584_vm3 = vcmask 31744   ;;  %p1173_p0 = scmp.lt.s32.totalorder %s1167_s1, %s1822_s11 }
  0x15   : > { %s1102_s29 = sshll.u32 %s381_s28, 6  ;;  %v485_v22 = vld [vmem:[%s1813_s2 + $0xc8] sm:$0xff]  ;;  %v484_v24 = vld [vmem:[%s1813_s2 + $0xc0] sm:$0xff]  ;;  %v483_v25 = vld [vmem:[%s1813_s2 + $0xb8] sm:$0xff]  ;;  %1149 = vset.pattern.permute.xlu1 %v1217_v60  ;;  %1147 = vset.pattern.permute.xlu2 %v1217_v60  ;;  %vm764_vm4 = vcmask 1040384   ;;  %vm760_vm5 = vcmask 72704  }
  0x16   : > { %s384_s13 = scalar_lea.vmem %s1811_s0, %s1102_s29  ;;  %522 = vmatpush.msra.mxu2 %v490_v15  ;;  %v482_v27 = vld [vmem:[%s1813_s2 + $0xb0] sm:$0xff]  ;;  %v481_v28 = vld [vmem:[%s1813_s2 + $0xa8] sm:$0xff]  ;;  %v480_v30 = vld [vmem:[%s1813_s2 + $0xa0] sm:$0xff]  ;;  %1148 = vset.pattern.permute.xlu0 %v1217_v60  ;;  %vm944_vm6 = vcmask 293888   ;;  %s997_s28 = scalar_lea.sflag [#allocation3], %s377_s27 }
  0x17   : > { %v1336_v0 = vld [vmem:[%s384_s13 + $0x30] sm:$0xff]  ;;  %v1338_v1 = vld [vmem:[%s384_s13 + $0x38] sm:$0xff]  ;;  %v1358_v6 = vld [vmem:[%s384_s13 + $0x20] sm:$0xff]  ;;  %s1168_s29 = scalar_lea.hbm %s1167_s1, 128 }
  0x18   : > { %v1340_v2 = vld [vmem:[%s384_s13 + $0x10] sm:$0xff]  ;;  %v412_v3 = vadd.f32 %v1338_v1, %v1336_v0  ;;  %399 = vst [vmem:[%s1344_s14 + $0x30] sm:$0xff] %v1336_v0  ;;  %v1348_v4 = vld [vmem:[%s384_s13 + $0x18] sm:$0xff]  ;;  %v1360_v7 = vld [vmem:[%s384_s13 + $0x28] sm:$0xff]  ;;  %523 = vmatpush.msra.mxu2 %v489_v16  ;;  %p1169_p11 = scmp.ne.s32.totalorder %s1167_s1, %s1168_s29  ;;  %p1174_p1 = scmp.lt.s32.totalorder %s1172_s12, %s1168_s29 }
  0x19   : > { %400 = vst [vmem:[%s1344_s14 + $0x38] sm:$0xff] %v1338_v1  ;;  %v406_v5 = vadd.f32 %v1348_v4, %v1340_v2  ;;  %v1364_v8 = vld [vmem:[%s384_s13] sm:$0xff]  ;;  %v1366_v9 = vld [vmem:[%s384_s13 + $0x8] sm:$0xff]  ;;  %v409_v10 = vadd.f32 %v1360_v7, %v1358_v6  ;;  %v479_v34 = vld [vmem:[%s1813_s2 + $0x98] sm:$0xff] }
  0x1a   : > { %413 = vadd.xlane.f32.xlu0 %v412_v3  ;;  %395 = vst [vmem:[%s1344_s14 + $0x10] sm:$0xff] %v1340_v2  ;;  %v403_v11 = vadd.f32 %v1366_v9, %v1364_v8  ;;  %v1151_v14 = vpop.eup %1150  ;;  %524 = vmatpush.msra.mxu2 %v488_v18  ;;  %v478_v35 = vld [vmem:[%s1813_s2 + $0x90] sm:$0xff]  ;;  %v477_v36 = vld [vmem:[%s1813_s2 + $0x88] sm:$0xff]  ;;  %v476_v37 = vld [vmem:[%s1813_s2 + $0x80] sm:$0xff]  ;;  %p1170_p12 = pnand %p1169_p11, %p1318_p5  ;;  %p1175_p2 = por %p1174_p1, %p1173_p0 }
  0x1b   : > { %407 = vadd.xlane.f32.xlu1 %v406_v5  ;;  %396 = vst [vmem:[%s1344_s14 + $0x18] sm:$0xff] %v1348_v4  ;;  %v416_v17 = vmul.f32 256.0, %v1151_v14  ;;  %vm420_vm0 = vweird.f32 %v1151_v14  ;;  %v475_v43 = vld [vmem:[%s1813_s2 + $0x78] sm:$0xff]  ;;  %v401_v44 = vld [vmem:[%s1820_s9] sm:$0xff]  ;;  %v474_v45 = vld [vmem:[%s1813_s2 + $0x70] sm:$0xff] }
  0x1c   : > { %397 = vst [vmem:[%s1344_s14 + $0x20] sm:$0xff] %v1358_v6  ;;  %525 = vmatpush.msra.mxu2 %v487_v19  ;;  %v473_v46 = vld [vmem:[%s1813_s2 + $0x68] sm:$0xff]  ;;  %v472_v47 = vld [vmem:[%s1813_s2 + $0x60] sm:$0xff]  ;;  %v471_v48 = vld [vmem:[%s1813_s2 + $0x58] sm:$0xff]  ;;  %p1171_p13 = pneg %p1170_p12 }
  0x1d   : > { %398 = vst [vmem:[%s1344_s14 + $0x28] sm:$0xff] %v1360_v7  ;;  %v417_v20 = vsub.f32 1.0, %v416_v17  ;;  %v470_v49 = vld [vmem:[%s1813_s2 + $0x50] sm:$0xff]  ;;  %v469_v50 = vld [vmem:[%s1813_s2 + $0x48] sm:$0xff]  ;;  %v468_v51 = vld [vmem:[%s1813_s2 + $0x40] sm:$0xff] }
  0x1e   : > { %393 = vst [vmem:[%s1344_s14] sm:$0xff] %v1364_v8  ;;  %526 = vmatpush.msra.mxu2 %v486_v21  ;;  %v467_v52 = vld [vmem:[%s1813_s2 + $0x38] sm:$0xff]  ;;  %v466_v53 = vld [vmem:[%s1813_s2 + $0x30] sm:$0xff]  ;;  %v465_v54 = vld [vmem:[%s1813_s2 + $0x28] sm:$0xff]  ;;  %p1176_p3 = pnand %p1175_p2, %p1171_p13 }
  0x1f   : > { %394 = vst [vmem:[%s1344_s14 + $0x8] sm:$0xff] %v1366_v9  ;;  %v418_v23 = vmul.f32 %v1151_v14, %v417_v20  ;;  %v464_v55 = vld [vmem:[%s1813_s2 + $0x20] sm:$0xff]  ;;  %v463_v56 = vld [vmem:[%s1813_s2 + $0x18] sm:$0xff]  ;;  %v462_v57 = vld [vmem:[%s1813_s2 + $0x10] sm:$0xff] }
  0x20   : > { %527 = vmatpush.msra.mxu2 %v485_v22  ;;  %v461_v58 = vld [vmem:[%s1813_s2 + $0x8] sm:$0xff]  ;;  %v460_v59 = vld [vmem:[%s1813_s2] sm:$0xff] }
  0x21   : > { %v419_v26 = vadd.f32 %v1151_v14, %v418_v23  ;;  %v402_v61 = vld [vmem:[%s1821_s10] sm:$0xff]  ;;  %v459_v12 = vld [vmem:[%s1821_s10 + $0x8] sm:$0xff] }
  0x22   : > { %410 = vadd.xlane.f32.xlu0 %v409_v10  ;;  %528 = vmatpush.msra.mxu2 %v484_v24  ;;  %v458_v23 = vld [vmem:[%s1820_s9 + $0x8] sm:$0xff]  ;;  %v579_v24 = vld [vmem:[%s1817_s6] sm:$0xff] }
  0x23   : > { %404 = vadd.xlane.f32.xlu1 %v403_v11  ;;  %v421_v29 = vsel %vm420_vm0, %v1151_v14, %v419_v26  ;;  %552 = vperm.xlu2 %1147, %v459_v12   ;;  %v636_v14 = vld [vmem:[%s1821_s10 + $0x10] sm:$0xff]  ;;  %581 = vst [vmem:[#allocation1] ss:$2 sm:$0xff] %v579_v24  ;;  %v652_v26 = vld [vmem:[%s1814_s3 + $0x78] sm:$0xff]  ;;  %v844_v12 = vld [vmem:[%s1815_s4 + $0xe8] sm:$0xff] }
  0x24   : > { %529 = vmatpush.msra.mxu2 %v483_v25  ;;  %v668_v25 = vld [vmem:[%s1814_s3 + $0xf8] sm:$0xff]  ;;  %v837_v24 = vld [vmem:[%s1815_s4 + $0xb0] sm:$0xff] }
  0x26   : > { %530 = vmatpush.msra.mxu2 %v482_v27 }
  0x28   : > { %531 = vmatpush.msra.mxu2 %v481_v28 }
  0x2a   : > { %532 = vmatpush.msra.mxu2 %v480_v30  ;;  %v583_v27 = vld.sshfl [vmem:[#allocation1 + $0x8] sm:$0xff pattern:$0x75316420]  ;;  %v582_v28 = vld.sshfl [vmem:[#allocation1] sm:$0xff pattern:$0x75316420] }
  0x2b   : > { %729 = vperm.xlu2 %1147, %v636_v14   ;;  %1085 = vmatpush.msk.msra.mxu3 %vm588_vm2, %v583_v27  ;;  %v651_v30 = vld [vmem:[%s1814_s3 + $0x70] sm:$0xff]  ;;  %v843_v14 = vld [vmem:[%s1815_s4 + $0xe0] sm:$0xff]  ;;  %v822_v27 = vld [vmem:[%s1815_s4 + $0x38] sm:$0xff] }
  0x2c   : > { %533 = vmatpush.msra.mxu2 %v479_v34  ;;  %1083 = vmatpush.msk.msra.mxu0 %vm588_vm2, %v582_v28  ;;  %v649_v34 = vld [vmem:[%s1814_s3 + $0x60] sm:$0xff] }
  0x2d   : > { %698 = vmatpush.msrb.mxu3 %v668_v25  ;;  %v823_v25 = vld [vmem:[%s1815_s4 + $0x40] sm:$0xff] }
  0x2e   : > { %534 = vmatpush.msra.mxu2 %v478_v35  ;;  %669 = vmatpush.msrb.mxu0 %v652_v26  ;;  %v664_v35 = vld [vmem:[%s1814_s3 + $0xd8] sm:$0xff]  ;;  %v836_v26 = vld [vmem:[%s1815_s4 + $0xa8] sm:$0xff]  ;;  %v835_v28 = vld [vmem:[%s1815_s4 + $0xa0] sm:$0xff] }
  0x30   : > { %535 = vmatpush.msra.mxu2 %v477_v36  ;;  %670 = vmatpush.msrb.mxu0 %v651_v30  ;;  %v648_v36 = vld [vmem:[%s1814_s3 + $0x58] sm:$0xff] }
  0x31   : > { %v834_v30 = vld [vmem:[%s1815_s4 + $0x98] sm:$0xff] }
  0x32   : > { %536 = vmatpush.msra.mxu2 %v476_v37  ;;  %v663_v37 = vld [vmem:[%s1814_s3 + $0xd0] sm:$0xff] }
  0x33   : > { %537 = vmatmul.f32.vlgmr.msra.gmra.mxu2 %v1366_v9 }
  0x3b   : > { %540 = vmatmul.f32.gmra.mxu2 %v1348_v4 }
  0x43   : > { %543 = vmatmul.f32.gmra.mxu2 %v1360_v7 }
  0x4b   : > { %546 = vmatmul.f32.gmra.mxu2 %v1338_v1 }
  0x7d   : > { %v553_v60 = vpop.permute.xlu2 %552 }
  0x8d   : > { %v414_v31 = vpop.xlane.xlu0 %413 }
  0x8e   : > { %v425_v32 = vmul.f32 %v421_v29, %v414_v31  ;;  %v408_v33 = vpop.xlane.xlu1 %407  ;;  %v666_v31 = vld [vmem:[%s1814_s3 + $0xe8] sm:$0xff] }
  0x8f   : > { %v423_v41 = vmul.f32 %v421_v29, %v408_v33  ;;  %v665_v33 = vld [vmem:[%s1814_s3 + $0xe0] sm:$0xff] }
  0x90   : > { %442 = vmatpush.msra.mxu1 %v425_v32  ;;  %v650_v32 = vld [vmem:[%s1814_s3 + $0x68] sm:$0xff] }
  0x91   : > { %671 = vmatpush.msrb.mxu0 %v650_v32  ;;  %v833_v32 = vld [vmem:[%s1815_s4 + $0x90] sm:$0xff] }
  0x93   : > { %672 = vmatpush.msrb.mxu0 %v649_v34  ;;  %v832_v34 = vld [vmem:[%s1815_s4 + $0x88] sm:$0xff] }
  0x95   : > { %v411_v38 = vpop.xlane.xlu0 %410  ;;  %673 = vmatpush.msrb.mxu0 %v648_v36  ;;  %v831_v36 = vld [vmem:[%s1815_s4 + $0x80] sm:$0xff] }
  0x96   : > { %v424_v39 = vmul.f32 %v421_v29, %v411_v38  ;;  %v405_v40 = vpop.xlane.xlu1 %404  ;;  %v647_v38 = vld [vmem:[%s1814_s3 + $0x50] sm:$0xff] }
  0x97   : > { %v422_v42 = vmul.f32 %v421_v29, %v405_v40  ;;  %v667_v29 = vld [vmem:[%s1814_s3 + $0xf0] sm:$0xff]  ;;  %v646_v40 = vld [vmem:[%s1814_s3 + $0x48] sm:$0xff]  ;;  %674 = vmatpush.msrb.mxu0 %v647_v38 }
  0x98   : > { %443 = vmatpush.msra.mxu1 %v424_v39  ;;  %699 = vmatpush.msrb.mxu3 %v667_v29  ;;  %v662_v39 = vld [vmem:[%s1814_s3 + $0xc8] sm:$0xff]  ;;  %v821_v29 = vld [vmem:[%s1815_s4 + $0x30] sm:$0xff] }
  0x99   : > { %675 = vmatpush.msrb.mxu0 %v646_v40  ;;  %v816_v38 = vld [vmem:[%s1815_s4 + $0x8] sm:$0xff] }
  0x9a   : > { %444 = vmatpush.msra.mxu1 %v423_v41  ;;  %700 = vmatpush.msrb.mxu3 %v666_v31  ;;  %v661_v41 = vld [vmem:[%s1814_s3 + $0xc0] sm:$0xff]  ;;  %v820_v31 = vld [vmem:[%s1815_s4 + $0x28] sm:$0xff] }
  0x9c   : > { %445 = vmatpush.msra.mxu1 %v422_v42  ;;  %701 = vmatpush.msrb.mxu3 %v665_v33  ;;  %v660_v42 = vld [vmem:[%s1814_s3 + $0xb8] sm:$0xff]  ;;  %v819_v33 = vld [vmem:[%s1815_s4 + $0x20] sm:$0xff] }
  0x9d   : > { %1081 = vmatmul.msk.f32.vlgmr.msra.gmra.mxu1 %vm426_vm1, %v401_v44 }
  0x9e   : > { %492 = vmatpush.msrb.mxu1 %v475_v43  ;;  %702 = vmatpush.msrb.mxu3 %v664_v35  ;;  %v659_v43 = vld [vmem:[%s1814_s3 + $0xb0] sm:$0xff]  ;;  %v818_v35 = vld [vmem:[%s1815_s4 + $0x18] sm:$0xff] }
  0xa0   : > { %493 = vmatpush.msrb.mxu1 %v474_v45  ;;  %703 = vmatpush.msrb.mxu3 %v663_v37  ;;  %v645_v45 = vld [vmem:[%s1814_s3 + $0x40] sm:$0xff]  ;;  %v817_v37 = vld [vmem:[%s1815_s4 + $0x10] sm:$0xff] }
  0xa1   : > { %676 = vmatpush.msrb.mxu0 %v645_v45 }
  0xa2   : > { %494 = vmatpush.msrb.mxu1 %v473_v46  ;;  %704 = vmatpush.msrb.mxu3 %v662_v39  ;;  %v658_v46 = vld [vmem:[%s1814_s3 + $0xa8] sm:$0xff]  ;;  %v815_v39 = vld [vmem:[%s1815_s4] sm:$0xff] }
  0xa4   : > { %495 = vmatpush.msrb.mxu1 %v472_v47  ;;  %705 = vmatpush.msrb.mxu3 %v661_v41  ;;  %v644_v47 = vld [vmem:[%s1814_s3 + $0x38] sm:$0xff] }
  0xa5   : > { %677 = vmatpush.msrb.mxu0 %v644_v47  ;;  %v758_v47 = vld [vmem:[%s1818_s7 + $0x10] sm:$0x1] }
  0xa6   : > { %496 = vmatpush.msrb.mxu1 %v471_v48  ;;  %706 = vmatpush.msrb.mxu3 %v660_v42  ;;  %v657_v48 = vld [vmem:[%s1814_s3 + $0xa0] sm:$0xff] }
  0xa8   : > { %497 = vmatpush.msrb.mxu1 %v470_v49  ;;  %707 = vmatpush.msrb.mxu3 %v659_v43  ;;  %v643_v49 = vld [vmem:[%s1814_s3 + $0x30] sm:$0xff] }
  0xa9   : > { %678 = vmatpush.msrb.mxu0 %v643_v49 }
  0xaa   : > { %498 = vmatpush.msrb.mxu1 %v469_v50  ;;  %708 = vmatpush.msrb.mxu3 %v658_v46  ;;  %v656_v50 = vld [vmem:[%s1814_s3 + $0x98] sm:$0xff] }
  0xac   : > { %499 = vmatpush.msrb.mxu1 %v468_v51  ;;  %709 = vmatpush.msrb.mxu3 %v657_v48  ;;  %v642_v51 = vld [vmem:[%s1814_s3 + $0x28] sm:$0xff]  ;;  %v756_v48 = vld [vmem:[%s1818_s7] sm:$0xff] }
  0xad   : > { %679 = vmatpush.msrb.mxu0 %v642_v51 }
  0xae   : > { %500 = vmatpush.msrb.mxu1 %v467_v52  ;;  %710 = vmatpush.msrb.mxu3 %v656_v50  ;;  %v655_v52 = vld [vmem:[%s1814_s3 + $0x90] sm:$0xff] }
  0xb0   : > { %501 = vmatpush.msrb.mxu1 %v466_v53  ;;  %v641_v53 = vld [vmem:[%s1814_s3 + $0x20] sm:$0xff]  ;;  %711 = vmatpush.msrb.mxu3 %v655_v52 }
  0xb1   : > { %680 = vmatpush.msrb.mxu0 %v641_v53 }
  0xb2   : > { %502 = vmatpush.msrb.mxu1 %v465_v54  ;;  %v654_v54 = vld [vmem:[%s1814_s3 + $0x88] sm:$0xff] }
  0xb3   : > { %712 = vmatpush.msrb.mxu3 %v654_v54 }
  0xb4   : > { %503 = vmatpush.msrb.mxu1 %v464_v55  ;;  %v640_v55 = vld [vmem:[%s1814_s3 + $0x18] sm:$0xff] }
  0xb5   : > { %681 = vmatpush.msrb.mxu0 %v640_v55 }
  0xb6   : > { %504 = vmatpush.msrb.mxu1 %v463_v56  ;;  %v538_v5 = vpop.f32.mrf.mxu2  ;;  %v653_v56 = vld [vmem:[%s1814_s3 + $0x80] sm:$0xff] }
  0xb7   : > { %713 = vmatpush.msrb.mxu3 %v653_v56 }
  0xb8   : > { %505 = vmatpush.msrb.mxu1 %v462_v57  ;;  %v639_v57 = vld [vmem:[%s1814_s3 + $0x10] sm:$0xff] }
  0xb9   : > { %682 = vmatpush.msrb.mxu0 %v639_v57 }
  0xba   : > { %506 = vmatpush.msrb.mxu1 %v461_v58  ;;  %v638_v58 = vld [vmem:[%s1814_s3 + $0x8] sm:$0xff] }
  0xbb   : > { %683 = vmatpush.msrb.mxu0 %v638_v58 }
  0xbc   : > { %507 = vmatpush.msrb.mxu1 %v460_v59  ;;  %v637_v59 = vld [vmem:[%s1814_s3] sm:$0xff] }
  0xbd   : > { %508 = vmatmul.f32.vlgmr.msrb.gmra.mxu1 %v1364_v8  ;;  %684 = vmatpush.msrb.mxu0 %v637_v59 }
  0xbe   : > { %v541_v11 = vpop.f32.mrf.mxu2 }
  0xc5   : > { %511 = vmatmul.f32.gmra.mxu1 %v1340_v2 }
  0xc6   : > { %v544_v15 = vpop.f32.mrf.mxu2 }
  0xcd   : > { %514 = vmatmul.f32.gmra.mxu1 %v1358_v6 }
  0xce   : > { %v547_v17 = vpop.f32.mrf.mxu2 }
  0xd5   : > { %517 = vmatmul.f32.gmra.mxu1 %v1336_v0 }
 0x11a   : > { %v447_v62 = vpop.f32.mrf.mxu1 }
 0x11b   : > { %v448_v63 = vadd.f32 %v447_v62, %v402_v61 }
 0x11d   : > { %v450_v3 = vmax.f32 %v448_v63, 0.0 }
 0x11f   : > { %453 = vperm.xlu1 %1149, %v450_v3   ;;  %v846_v3 = vld [vmem:[%s1815_s4 + $0xf8] sm:$0xff] }
 0x13a   : > { %v509_v10 = vpop.f32.mrf.mxu1 }
 0x13b   : > { %v539_v22 = vadd.f32 %v538_v5, %v509_v10  ;;  %v845_v5 = vld [vmem:[%s1815_s4 + $0xf0] sm:$0xff]  ;;  %v830_v10 = vld [vmem:[%s1815_s4 + $0x78] sm:$0xff] }
 0x142   : > { %v512_v13 = vpop.f32.mrf.mxu1 }
 0x143   : > { %v542_v21 = vadd.f32 %v541_v11, %v512_v13  ;;  %v829_v11 = vld [vmem:[%s1815_s4 + $0x70] sm:$0xff]  ;;  %v828_v13 = vld [vmem:[%s1815_s4 + $0x68] sm:$0xff] }
 0x14a   : > { %v515_v16 = vpop.f32.mrf.mxu1 }
 0x14b   : > { %v545_v20 = vadd.f32 %v544_v15, %v515_v16  ;;  %v842_v15 = vld [vmem:[%s1815_s4 + $0xd8] sm:$0xff]  ;;  %v827_v16 = vld [vmem:[%s1815_s4 + $0x60] sm:$0xff] }
 0x152   : > { %v518_v18 = vpop.f32.mrf.mxu1 }
 0x153   : > { %v548_v19 = vadd.f32 %v547_v17, %v518_v18  ;;  %v841_v17 = vld [vmem:[%s1815_s4 + $0xd0] sm:$0xff]  ;;  %v826_v18 = vld [vmem:[%s1815_s4 + $0x58] sm:$0xff] }
 0x155   : > { %570 = vmatpush.msrb.mxu2 %v548_v19  ;;  %v840_v19 = vld [vmem:[%s1815_s4 + $0xc8] sm:$0xff] }
 0x157   : > { %571 = vmatpush.msrb.mxu2 %v545_v20  ;;  %v839_v20 = vld [vmem:[%s1815_s4 + $0xc0] sm:$0xff] }
 0x159   : > { %572 = vmatpush.msrb.mxu2 %v542_v21  ;;  %v825_v21 = vld [vmem:[%s1815_s4 + $0x50] sm:$0xff] }
 0x15b   : > { %573 = vmatpush.msrb.mxu2 %v539_v22  ;;  %v838_v22 = vld [vmem:[%s1815_s4 + $0xb8] sm:$0xff] }
 0x15c   : > { %1082 = vmatmul.msk.f32.vlgmr.msrb.gmra.mxu2 %vm426_vm1, %v458_v23  ;;  %v824_v23 = vld [vmem:[%s1815_s4 + $0x48] sm:$0xff] }
 0x15d   : > { %1088 = vmatpush.msk.msra.mxu2 %vm764_vm4, %v758_v47 }
 0x15f   : > { %786 = vmatpush.msra.mxu2 %v756_v48 }
 0x191   : > { %v454_v44 = vpop.permute.xlu1 %453 }
 0x192   : > { %456 = vst [vmem:[%s1344_s14 + $0x40] sm:$0xff] %v454_v44 }
 0x193   : > { %457 = vst [vmem:[%s1344_s14 + $0x48] sm:$0xff] %v454_v44 }
 0x1df   : > { %v575_v61 = vpop.f32.mrf.mxu2 }
 0x1e0   : > { %v576_v62 = vadd.f32 %v575_v61, %v553_v60  ;;  %v759_v61 = vld [vmem:[%s1818_s7 + $0x18] sm:$0x1] }
 0x1e2   : > { %v578_v63 = vmax.f32 %v576_v62, 0.0  ;;  %v757_v62 = vld [vmem:[%s1818_s7 + $0x8] sm:$0xff] }
 0x1e4   : > { %1084 = vmatmul.msk.f32.vlgmr.msra.gmra.mxu0 %vm584_vm3, %v578_v63  ;;  %1086 = vmatmul.msk.f32.vlgmr.msra.gmra.mxu3 %vm584_vm3, %v578_v63  ;;  %v814_v63 = vld [vmem:[%s1821_s10 + $0x18] sm:$0xff] }
 0x1e5   : > { %876 = vmatpush.msra.mxu3 %v846_v3  ;;  %847 = vmatpush.msra.mxu0 %v830_v10  ;;  %v730_v3 = vpop.permute.xlu2 %729 }
 0x1e6   : > { %907 = vperm.xlu0 %1148, %v814_v63  }
 0x1e7   : > { %877 = vmatpush.msra.mxu3 %v845_v5  ;;  %848 = vmatpush.msra.mxu0 %v829_v11 }
 0x1e9   : > { %878 = vmatpush.msra.mxu3 %v844_v12  ;;  %849 = vmatpush.msra.mxu0 %v828_v13  ;;  %v813_v12 = vld [vmem:[%s1820_s9 + $0x18] sm:$0xff]  ;;  %v942_v13 = vld [vmem:[%s1819_s8 + $0x40] sm:$0xf] }
 0x1eb   : > { %879 = vmatpush.msra.mxu3 %v843_v14  ;;  %850 = vmatpush.msra.mxu0 %v827_v16  ;;  %v943_v14 = vld [vmem:[%s1819_s8 + $0x48] sm:$0xf]  ;;  %v941_v16 = vld [vmem:[%s1819_s8 + $0x38] sm:$0xff] }
 0x1ec   : > { %714 = vmatmul.f32.vlgmr.msrb.gmra.mxu3 %v1366_v9  ;;  %685 = vmatmul.f32.vlgmr.msrb.gmra.mxu0 %v1364_v8 }
 0x1ed   : > { %880 = vmatpush.msra.mxu3 %v842_v15  ;;  %851 = vmatpush.msra.mxu0 %v826_v18  ;;  %v940_v15 = vld [vmem:[%s1819_s8 + $0x30] sm:$0xff]  ;;  %v939_v18 = vld [vmem:[%s1819_s8 + $0x28] sm:$0xff] }
 0x1ef   : > { %881 = vmatpush.msra.mxu3 %v841_v17  ;;  %852 = vmatpush.msra.mxu0 %v825_v21  ;;  %v938_v17 = vld [vmem:[%s1819_s8 + $0x20] sm:$0xff] }
 0x1f0   : > { %v934_v21 = vld [vmem:[%s1819_s8] sm:$0xff] }
 0x1f1   : > { %882 = vmatpush.msra.mxu3 %v840_v19  ;;  %853 = vmatpush.msra.mxu0 %v824_v23  ;;  %v936_v19 = vld [vmem:[%s1819_s8 + $0x10] sm:$0xff] }
 0x1f3   : > { %883 = vmatpush.msra.mxu3 %v839_v20  ;;  %854 = vmatpush.msra.mxu0 %v823_v25  ;;  %v937_v20 = vld [vmem:[%s1819_s8 + $0x18] sm:$0xff] }
 0x1f4   : > { %717 = vmatmul.f32.gmra.mxu3 %v1348_v4  ;;  %688 = vmatmul.f32.gmra.mxu0 %v1340_v2 }
 0x1f5   : > { %884 = vmatpush.msra.mxu3 %v838_v22  ;;  %855 = vmatpush.msra.mxu0 %v822_v27  ;;  %v935_v22 = vld [vmem:[%s1819_s8 + $0x8] sm:$0xff] }
 0x1f7   : > { %885 = vmatpush.msra.mxu3 %v837_v24  ;;  %856 = vmatpush.msra.mxu0 %v821_v29 }
 0x1f9   : > { %886 = vmatpush.msra.mxu3 %v836_v26  ;;  %857 = vmatpush.msra.mxu0 %v820_v31 }
 0x1fb   : > { %887 = vmatpush.msra.mxu3 %v835_v28  ;;  %858 = vmatpush.msra.mxu0 %v819_v33 }
 0x1fc   : > { %720 = vmatmul.f32.gmra.mxu3 %v1360_v7  ;;  %691 = vmatmul.f32.gmra.mxu0 %v1358_v6 }
 0x1fd   : > { %888 = vmatpush.msra.mxu3 %v834_v30  ;;  %859 = vmatpush.msra.mxu0 %v818_v35 }
 0x1ff   : > { %889 = vmatpush.msra.mxu3 %v833_v32  ;;  %860 = vmatpush.msra.mxu0 %v817_v37 }
 0x201   : > { %890 = vmatpush.msra.mxu3 %v832_v34  ;;  %861 = vmatpush.msra.mxu0 %v816_v38 }
 0x203   : > { %891 = vmatpush.msra.mxu3 %v831_v36  ;;  %862 = vmatpush.msra.mxu0 %v815_v39 }
 0x204   : > { %723 = vmatmul.f32.gmra.mxu3 %v1338_v1  ;;  %694 = vmatmul.f32.gmra.mxu0 %v1336_v0 }
 0x20c   : > { %892 = vmatmul.f32.vlgmr.msra.gmra.mxu3 %v1366_v9  ;;  %863 = vmatmul.f32.vlgmr.msra.gmra.mxu0 %v1364_v8 }
 0x214   : > { %895 = vmatmul.f32.gmra.mxu3 %v1348_v4  ;;  %866 = vmatmul.f32.gmra.mxu0 %v1340_v2 }
 0x21c   : > { %898 = vmatmul.f32.gmra.mxu3 %v1360_v7  ;;  %869 = vmatmul.f32.gmra.mxu0 %v1358_v6 }
 0x224   : > { %901 = vmatmul.f32.gmra.mxu3 %v1338_v1  ;;  %872 = vmatmul.f32.gmra.mxu0 %v1336_v0  ;;  %v635_v0 = vld [vmem:[%s1820_s9 + $0x10] sm:$0xff] }
 0x258   : > { %v908_v25 = vpop.permute.xlu0 %907 }
 0x261   : > { %v610_v9 = vpop.f32.mrf.mxu0 }
 0x262   : > { %633 = vst [vmem:[%s1344_s14 + $0x50] sm:$0xff] %v610_v9 }
 0x267   : > { %v630_v40 = vpop.f32.mrf.mxu3 }
 0x268   : > { %634 = vst [vmem:[%s1344_s14 + $0x58] sm:$0xff] %v630_v40 }
 0x269   : > { %v686_v41 = vpop.f32.mrf.mxu0 }
 0x26f   : > { %v715_v42 = vpop.f32.mrf.mxu3 }
 0x270   : > { %v716_v1 = vadd.f32 %v715_v42, %v686_v41 }
 0x271   : > { %v689_v43 = vpop.f32.mrf.mxu0 }
 0x277   : > { %v718_v8 = vpop.f32.mrf.mxu3 }
 0x278   : > { %v719_v6 = vadd.f32 %v718_v8, %v689_v43 }
 0x279   : > { %v692_v44 = vpop.f32.mrf.mxu0 }
 0x27f   : > { %v721_v4 = vpop.f32.mrf.mxu3 }
 0x280   : > { %v722_v7 = vadd.f32 %v721_v4, %v692_v44 }
 0x281   : > { %v695_v45 = vpop.f32.mrf.mxu0 }
 0x287   : > { %v724_v2 = vpop.f32.mrf.mxu3 }
 0x288   : > { %v725_v46 = vadd.f32 %v724_v2, %v695_v45 }
 0x289   : > { %v864_v49 = vpop.f32.mrf.mxu0 }
 0x28a   : > { %747 = vmatpush.msra.mxu1 %v725_v46 }
 0x28c   : > { %748 = vmatpush.msra.mxu1 %v722_v7 }
 0x28e   : > { %749 = vmatpush.msra.mxu1 %v719_v6 }
 0x28f   : > { %v893_v50 = vpop.f32.mrf.mxu3 }
 0x290   : > { %750 = vmatpush.msra.mxu1 %v716_v1  ;;  %v894_v60 = vadd.f32 %v893_v50, %v864_v49 }
 0x291   : > { %1087 = vmatmul.msk.f32.vlgmr.msra.gmra.mxu1 %vm426_vm1, %v635_v0  ;;  %v867_v51 = vpop.f32.mrf.mxu0 }
 0x292   : > { %1090 = vmatpush.msk.msrb.mxu1 %vm764_vm4, %v759_v61 }
 0x294   : > { %806 = vmatpush.msrb.mxu1 %v757_v62 }
 0x296   : > { %1093 = vmatpush.msk.msra.mxu1 %vm588_vm2, %v942_v13 }
 0x297   : > { %v896_v52 = vpop.f32.mrf.mxu3 }
 0x298   : > { %v897_v59 = vadd.f32 %v896_v52, %v867_v51  ;;  %966 = vmatpush.msra.mxu1 %v940_v15 }
 0x299   : > { %v870_v53 = vpop.f32.mrf.mxu0 }
 0x29a   : > { %967 = vmatpush.msra.mxu1 %v938_v17 }
 0x29c   : > { %968 = vmatpush.msra.mxu1 %v936_v19 }
 0x29e   : > { %969 = vmatpush.msra.mxu1 %v934_v21 }
 0x29f   : > { %v899_v54 = vpop.f32.mrf.mxu3 }
 0x2a0   : > { %v900_v57 = vadd.f32 %v899_v54, %v870_v53 }
 0x2a1   : > { %v873_v55 = vpop.f32.mrf.mxu0 }
 0x2a7   : > { %v902_v56 = vpop.f32.mrf.mxu3 }
 0x2a8   : > { %v903_v58 = vadd.f32 %v902_v56, %v873_v55 }
 0x2aa   : > { %925 = vmatpush.msrb.mxu2 %v903_v58 }
 0x2ac   : > { %926 = vmatpush.msrb.mxu2 %v900_v57 }
 0x2ae   : > { %927 = vmatpush.msrb.mxu2 %v897_v59 }
 0x2b0   : > { %928 = vmatpush.msrb.mxu2 %v894_v60 }
 0x30e   : > { %v752_v5 = vpop.f32.mrf.mxu1 }
 0x30f   : > { %v753_v10 = vadd.f32 %v752_v5, %v730_v3 }
 0x311   : > { %v755_v11 = vmax.f32 %v753_v10, 0.0 }
 0x313   : > { %1089 = vmatmul.msk.f32.vlgmr.msra.gmra.mxu2 %vm760_vm5, %v755_v11  ;;  %1091 = vmatmul.msk.f32.vlgmr.msrb.gmra.mxu1 %vm760_vm5, %v755_v11 }
 0x314   : > { %1095 = vmatpush.msk.msra.mxu2 %vm588_vm2, %v943_v14 }
 0x316   : > { %986 = vmatpush.msra.mxu2 %v941_v16 }
 0x318   : > { %987 = vmatpush.msra.mxu2 %v939_v18 }
 0x31a   : > { %988 = vmatpush.msra.mxu2 %v937_v20 }
 0x31b   : > { %1092 = vmatmul.msk.f32.vlgmr.msrb.gmra.mxu2 %vm426_vm1, %v813_v12 }
 0x31c   : > { %989 = vmatpush.msra.mxu2 %v935_v22 }
 0x390   : > { %v808_v23 = vpop.f32.mrf.mxu1 }
 0x391   : > { %812 = vst [vmem:[%s1344_s14 + $0x68] sm:$0xff] %v808_v23 }
 0x396   : > { %v788_v24 = vpop.f32.mrf.mxu2 }
 0x397   : > { %811 = vst [vmem:[%s1344_s14 + $0x60] sm:$0xff] %v788_v24 }
 0x39e   : > { %v930_v26 = vpop.f32.mrf.mxu2 }
 0x39f   : > { %v931_v27 = vadd.f32 %v930_v26, %v908_v25 }
 0x3a1   : > { %v933_v28 = vmax.f32 %v931_v27, 0.0 }
 0x3a3   : > { %1094 = vmatmul.msk.f32.vlgmr.msra.gmra.mxu1 %vm944_vm6, %v933_v28  ;;  %1096 = vmatmul.msk.f32.vlgmr.msra.gmra.mxu2 %vm944_vm6, %v933_v28 }
 0x420   : > { %v971_v29 = vpop.f32.mrf.mxu1 }
 0x421   : > { %994 = vst [vmem:[%s1344_s14 + $0x70] sm:$0xff] %v971_v29 }
 0x426   : > { %v991_v30 = vpop.f32.mrf.mxu2 }
 0x427   : > { %995 = vst [vmem:[%s1344_s14 + $0x78] sm:$0xff] %v991_v30 }
 0x428   : > { %1179 = shalt.err (!%p1176_p3)
}
 0x429   : > { %s1218_s27 = smov 256   ;;  %s1219_s14 = smov 16  }
 0x42a   : > { %1104 = dma.vmem_to_hbm [thread:$0]  (%p1318_p5), %s1010_s22, 2048, %s1012_s23, %s997_s28, %s1218_s27, %s1218_s27, %s1219_s14  }
 0x42b PF: > { %p1110_p4 = scmp.ge.s32.totalorder %s1214_s18, 2  ;;  %s1026_s20 = sand.u32 1, %s1202_s5  }
 0x42c   : > { %s1027_s19 = scalar_lea.sflag [#allocation3], %s1026_s20 }
 0x42d   : > { %p1107_p7 = pnand %p1110_p4, %p1322_p6 }
 0x42f   : > { %p1108_p8 = pneg %p1107_p7 }
 0x431   : > { %1197 = dma.done.wait (%p1108_p8), %s1027_s19, 2048  }
 0x432   : > { %1199 = vsyncadd (%p1108_p8), %s1027_s19, 4294965248  ;;  %p21_p9 = scmp.ge.s32.totalorder %s1305_s21, 4   ;;  %s1825_s5 = smov %s1206_s16 }
 0x433   : > { %s1826_s16 = smov %s1210_s17  ;;  %s1827_s17 = smov %s1316_s24 }
 0x434   : > { %s1828_s18 = smov %s1305_s21  ;;  %23 = sbr.rel (!%p21_p9) target bundleno = 3 (0x3), region = 99 }
 0x439   :  { %1033 = vsyncpa [#allocation3], 1 }
 0x43a   :  { %1035 = vsyncpa [#allocation3 + $0x1], 1 }

</bundles_post_ra>
